<compile_context>
chip_gen: v5e
topology: v5e:2x2
jax: 0.10.0
libtpu: 0.0.40
codegen_flags: <defaults>
</compile_context>

<pallas_src>
import functools
import math

import numpy as np
import jax
import jax.numpy as jnp
from jax import lax
from jax.experimental import pallas as pl
from jax.experimental.pallas import tpu as pltpu


def _norm_softmax_margin_kernel(emb_ref, wt_ref, label_ref, logits_ref, loss_ref,
                                m_sc, l_sc, t_sc,
                                *, cos_m, sin_m, th, mm, inv_t, tn):
    j = pl.program_id(1)                      # position along the num_instances axis

    @pl.when(j == 0)
    def _():
        m_sc[...] = jnp.full_like(m_sc, -jnp.inf)
        l_sc[...] = jnp.zeros_like(l_sc)
        t_sc[...] = jnp.zeros_like(t_sc)

    emb = emb_ref[...]                        # (bm, d)  f32 embeddings tile
    wt = wt_ref[...]                          # (d, tn)  f32 normalized weight^T tile
    labels = label_ref[...]                   # (bm, 1)  int32 labels tile

    # Cosine logits (embeddings are NOT normalized in the reference module).
    cosine = jnp.dot(emb, wt, preferred_element_type=jnp.float32)    # (bm, tn)

    # one-hot within this N tile: global column index = j*tn + lane
    col = lax.broadcasted_iota(jnp.int32, cosine.shape, 1) + j * tn
    one_hot = col == labels                                          # (bm, tn) bool
    lo = j * tn
    has_tgt = (labels >= lo) & (labels < lo + tn)                    # (bm, 1) bool

    # Margin math only on the per-row target cosine (zero when label not in this tile).
    tgt_cos = jnp.sum(jnp.where(one_hot, cosine, 0.0), axis=-1, keepdims=True)   # (bm,1)
    sine = jnp.sqrt(jnp.clip(1.0 - tgt_cos * tgt_cos, 0.0, 1.0))
    phi = tgt_cos * cos_m - sine * sin_m
    phi = jnp.where(tgt_cos > th, phi, tgt_cos - mm)                 # (bm, 1)

    # Substitute phi at the label column; elsewhere keep cosine.
    logits = jnp.where(one_hot, phi, cosine)                         # (bm, tn)
    logits_ref[...] = logits                                         # lane-dense store

    # Target logit is phi by construction (no second N-wide masked reduce needed).
    t_sc[...] = t_sc[...] + jnp.where(has_tgt, phi, 0.0)

    # Online logsumexp of logits / temperature; temperature folded into the exp arg.
    tile_max = jnp.max(logits, axis=-1, keepdims=True)               # (bm, 1)
    m_new = jnp.maximum(m_sc[...], tile_max)
    scale = jnp.exp((m_sc[...] - m_new) * inv_t)                     # == 0 at j == 0
    p = jnp.exp((logits - m_new) * inv_t)
    l_sc[...] = l_sc[...] * scale + jnp.sum(p, axis=-1, keepdims=True)
    m_sc[...] = m_new

    @pl.when(j == pl.num_programs(1) - 1)
    def _():
        lse = m_sc[...] * inv_t + jnp.log(l_sc[...])
        loss_ref[...] = lse - t_sc[...] * inv_t                      # (bm, 1) per-row CE


def _pick_block_n(n, block_n):
    """Largest multiple of 128 that divides n and is <= block_n; else the full N."""
    if n <= block_n or n <= 128:
        return n
    t = (block_n // 128) * 128
    while t >= 128:
        if n % t == 0:
            return t
        t -= 128
    return n


def _pick_block_m(b, block_m):
    """Batch tile: MXU-sized for large B; >= 2 tiles for small B (v7x has 2 TCs)."""
    if b <= block_m:
        half = -(-b // 2)
        return max(8, -(-half // 8) * 8)
    # Large B: keep MXU-sized tiles (raise block_m to 256 on v6e if VMEM allows).
    return block_m


def norm_softmax_margin(embeddings, labels, weight, *, margin=0.5, temperature=0.05,
                        block_m=128, block_n=512):
    embeddings = jnp.asarray(embeddings, jnp.float32)
    labels = jnp.asarray(labels, jnp.int32)
    weight = jnp.asarray(weight, jnp.float32)

    b, d = embeddings.shape
    n = weight.shape[0]

    cos_m = math.cos(margin)
    sin_m = math.sin(margin)
    th = math.cos(math.pi - margin)
    mm = math.sin(math.pi - margin) * margin

    # Grid-invariant prep hoisted out of the kernel: L2-normalize weight rows
    # (F.normalize eps=1e-12) and pre-transpose so the MXU contracts the RHS sublane dim.
    inv_norm = lax.rsqrt(jnp.maximum(jnp.sum(weight * weight, axis=1, keepdims=True), 1e-24))
    wt = (weight * inv_norm).T                                       # (D, N)

    bm = _pick_block_m(b, block_m)
    tn = _pick_block_n(n, block_n)
    b_pad = -(-b // bm) * bm

    lab = labels.reshape(b, 1)
    if b_pad != b:
        embeddings = jnp.pad(embeddings, ((0, b_pad - b), (0, 0)))
        lab = jnp.pad(lab, ((0, b_pad - b), (0, 0)))

    kernel = functools.partial(_norm_softmax_margin_kernel,
                               cos_m=cos_m, sin_m=sin_m, th=th, mm=mm,
                               inv_t=1.0 / temperature, tn=tn)

    # Exact VMEM accounting: double-buffered in/out blocks + scratch + headroom, <= 40 MiB
    # (leaves room for compiler-internal scratch under v7x's 64 MiB physical VMEM).
    blk_bytes = 4 * (2 * bm * d      # embeddings tile (double-buffered)
                     + 2 * d * tn    # weight^T tile
                     + 2 * bm        # labels tile
                     + 2 * bm * tn   # logits output tile
                     + 2 * bm        # loss output tile
                     + 3 * bm)       # m/l/target scratch
    vmem_limit = int(min(blk_bytes + (8 << 20), 40 << 20))

    logits_pad, loss_pad = pl.pallas_call(
        kernel,
        out_shape=(jax.ShapeDtypeStruct((b_pad, n), jnp.float32),
                   jax.ShapeDtypeStruct((b_pad, 1), jnp.float32)),
        grid_spec=pltpu.PrefetchScalarGridSpec(
            num_scalar_prefetch=0,
            grid=(b_pad // bm, n // tn),                  # batch "parallel", N "arbitrary" (last)
            in_specs=[
                pl.BlockSpec((bm, d), lambda i, j: (i, 0)),   # embeddings tile
                pl.BlockSpec((d, tn), lambda i, j: (0, j)),   # normalized weight^T tile
                pl.BlockSpec((bm, 1), lambda i, j: (i, 0)),   # labels tile
            ],
            out_specs=[
                pl.BlockSpec((bm, tn), lambda i, j: (i, j)),  # margin logits (lane-dense)
                pl.BlockSpec((bm, 1), lambda i, j: (i, 0)),   # per-row CE loss (resident over j)
            ],
            scratch_shapes=[pltpu.VMEM((bm, 1), jnp.float32)] * 3,   # running max / sum / target
        ),
        compiler_params=pltpu.CompilerParams(
            dimension_semantics=("parallel", "arbitrary"),
            vmem_limit_bytes=vmem_limit,
        ),
    )(embeddings, wt, lab)

    logits = logits_pad[:b]
    loss = jnp.mean(loss_pad[:b, 0])
    return logits, loss


class NormSoftmaxLossMargin:
    """JAX/Pallas mirror of the PyTorch NormSoftmaxLoss_Margin module."""

    def __init__(self, dim, num_instances, margin=0.5, temperature=0.05,
                 key=jax.random.PRNGKey(0)):
        stdv = 1.0 / math.sqrt(dim)
        self.weight = jax.random.uniform(key, (num_instances, dim), jnp.float32,
                                         minval=-stdv, maxval=stdv)
        self.margin = margin
        self.temperature = temperature

    def forward(self, embeddings, label, **kw):
        return norm_softmax_margin(embeddings, label, self.weight,
                                   margin=self.margin, temperature=self.temperature, **kw)

    __call__ = forward


def _reference(embeddings, labels, weight, margin, temperature):
    e = np.asarray(embeddings, np.float64)
    w = np.asarray(weight, np.float64)
    y = np.asarray(labels, np.int64)
    nw = w / np.maximum(np.linalg.norm(w, axis=1, keepdims=True), 1e-12)
    cosine = e @ nw.T
    sine = np.sqrt(np.clip(1.0 - cosine ** 2, 0.0, 1.0))
    cos_m, sin_m = math.cos(margin), math.sin(margin)
    th = math.cos(math.pi - margin)
    mm = math.sin(math.pi - margin) * margin
    phi = np.where(cosine > th, cosine * cos_m - sine * sin_m, cosine - mm)
    one_hot = np.zeros_like(cosine)
    one_hot[np.arange(e.shape[0]), y] = 1.0
    logits = one_hot * phi + (1.0 - one_hot) * cosine
    s = logits / temperature
    s = s - s.max(axis=1, keepdims=True)
    logp = s - np.log(np.exp(s).sum(axis=1, keepdims=True))
    loss = -logp[np.arange(e.shape[0]), y].mean()
    return logits, loss


if __name__ == "__main__":
    B, D, N = 48, 64, 512           # batch, embedding dim, num_instances (small test shapes)
    MARGIN, TEMP = 0.5, 0.05

    key = jax.random.PRNGKey(0)
    k_w, k_emb, k_lab = jax.random.split(key, 3)

    model = NormSoftmaxLossMargin(D, N, margin=MARGIN, temperature=TEMP, key=k_w)
    embeddings = jax.random.normal(k_emb, (B, D), jnp.float32)
    labels = jax.random.randint(k_lab, (B,), 0, N, jnp.int32)

    # block_n=128 exercises the multi-tile online softmax (4 N tiles, 2 batch tiles).
    logits, loss = model(embeddings, labels, block_n=128)
    logits, loss = jax.block_until_ready((logits, loss))

    ref_logits, ref_loss = _reference(embeddings, labels, model.weight, MARGIN, TEMP)
    np.testing.assert_allclose(np.asarray(logits), ref_logits, atol=1e-3, rtol=1e-3)
    assert abs(float(loss) - float(ref_loss)) < 5e-3, (float(loss), float(ref_loss))
    print("KERNEL_OK")
</pallas_src>

<mosaic_0001>
module attributes {stable_mosaic.version = 11 : i64} {
  func.func @_norm_softmax_margin_kernel(%arg0: i32, %arg1: i32, %arg2: memref<24x64xf32, #tpu.memory_space<vmem>>, %arg3: memref<64x128xf32, #tpu.memory_space<vmem>>, %arg4: memref<24x1xi32, #tpu.memory_space<vmem>>, %arg5: memref<24x128xf32, #tpu.memory_space<vmem>>, %arg6: memref<24x1xf32, #tpu.memory_space<vmem>>, %arg7: memref<24x1xf32, #tpu.memory_space<vmem>>, %arg8: memref<24x1xf32, #tpu.memory_space<vmem>>, %arg9: memref<24x1xf32, #tpu.memory_space<vmem>>) attributes {dimension_semantics = [#tpu.dimension_semantics<parallel>, #tpu.dimension_semantics<arbitrary>], iteration_bounds = array<i64: 2, 4>, scalar_prefetch = 0 : i64, scratch_operands = 3 : i64, tpu.core_type = #tpu.core_type<tc>, window_params = [{transform_indices = @transform_0, window_bounds = array<i64: 24, 64>}, {transform_indices = @transform_1, window_bounds = array<i64: 64, 128>}, {transform_indices = @transform_2, window_bounds = array<i64: 24, 1>}, {transform_indices = @transform_3, window_bounds = array<i64: 24, 128>}, {transform_indices = @transform_4, window_bounds = array<i64: 24, 1>}]} {
    %c0_i32 = arith.constant 0 : i32
    %0 = arith.cmpi eq, %arg1, %c0_i32 : i32
    %1 = arith.extui %0 : i1 to i32
    %c0_i32_0 = arith.constant 0 : i32
    %2 = arith.cmpi ne, %1, %c0_i32_0 : i32
    scf.if %2 {
      %cst_39 = arith.constant 0xFF800000 : f32
      %75 = vector.broadcast %cst_39 : f32 to vector<24x1xf32>
      %c0_40 = arith.constant 0 : index
      %c0_41 = arith.constant 0 : index
      %76 = vector.load %arg7[%c0_40, %c0_41] : memref<24x1xf32, #tpu.memory_space<vmem>>, vector<24x1xf32>
      tpu.vector_store %arg7[%c0_40, %c0_41], %75 {strides = array<i32>} : memref<24x1xf32, #tpu.memory_space<vmem>>, vector<24x1xf32>,
      %cst_42 = arith.constant 0.000000e+00 : f32
      %77 = vector.broadcast %cst_42 : f32 to vector<24x1xf32>
      %c0_43 = arith.constant 0 : index
      %c0_44 = arith.constant 0 : index
      %78 = vector.load %arg8[%c0_43, %c0_44] : memref<24x1xf32, #tpu.memory_space<vmem>>, vector<24x1xf32>
      tpu.vector_store %arg8[%c0_43, %c0_44], %77 {strides = array<i32>} : memref<24x1xf32, #tpu.memory_space<vmem>>, vector<24x1xf32>,
      %cst_45 = arith.constant 0.000000e+00 : f32
      %79 = vector.broadcast %cst_45 : f32 to vector<24x1xf32>
      %c0_46 = arith.constant 0 : index
      %c0_47 = arith.constant 0 : index
      %80 = vector.load %arg9[%c0_46, %c0_47] : memref<24x1xf32, #tpu.memory_space<vmem>>, vector<24x1xf32>
      tpu.vector_store %arg9[%c0_46, %c0_47], %79 {strides = array<i32>} : memref<24x1xf32, #tpu.memory_space<vmem>>, vector<24x1xf32>,
    } else {
    }
    %c0 = arith.constant 0 : index
    %c0_1 = arith.constant 0 : index
    %3 = vector.load %arg2[%c0, %c0_1] : memref<24x64xf32, #tpu.memory_space<vmem>>, vector<24x64xf32>
    %c0_2 = arith.constant 0 : index
    %c0_3 = arith.constant 0 : index
    %4 = vector.load %arg3[%c0_2, %c0_3] : memref<64x128xf32, #tpu.memory_space<vmem>>, vector<64x128xf32>
    %c0_4 = arith.constant 0 : index
    %c0_5 = arith.constant 0 : index
    %5 = vector.load %arg4[%c0_4, %c0_5] : memref<24x1xi32, #tpu.memory_space<vmem>>, vector<24x1xi32>
    %cst = arith.constant dense<0.000000e+00> : vector<24x128xf32>
    %6 = tpu.matmul %3, %4, %cst {dimension_numbers = #tpu.dot_dimension_numbers<[1], [0], [0], [1], [0, 0, 1, 1], [], []>} : vector<24x64xf32>, vector<64x128xf32>, vector<24x128xf32> -> vector<24x128xf32>
    %7 = tpu.iota {dimensions = array<i32: 1>} : vector<24x128xi32>
    %c128_i32 = arith.constant 128 : i32
    %8 = arith.muli %arg1, %c128_i32 : i32
    %9 = vector.broadcast %8 : i32 to vector<24x128xi32>
    %10 = arith.addi %7, %9 : vector<24x128xi32>
    %11 = vector.broadcast %5 : vector<24x1xi32> to vector<24x128xi32>
    %12 = arith.cmpi eq, %10, %11 : vector<24x128xi32>
    %c128_i32_6 = arith.constant 128 : i32
    %13 = arith.muli %arg1, %c128_i32_6 : i32
    %14 = vector.broadcast %13 : i32 to vector<24x1xi32>
    %15 = arith.cmpi sge, %5, %14 : vector<24x1xi32>
    %c128_i32_7 = arith.constant 128 : i32
    %16 = arith.addi %13, %c128_i32_7 : i32
    %17 = vector.broadcast %16 : i32 to vector<24x1xi32>
    %18 = arith.cmpi slt, %5, %17 : vector<24x1xi32>
    %19 = arith.andi %15, %18 : vector<24x1xi1>
    %cst_8 = arith.constant 0.000000e+00 : f32
    %20 = vector.broadcast %cst_8 : f32 to vector<24x128xf32>
    %21 = arith.select %12, %6, %20 : vector<24x128xi1>, vector<24x128xf32>
    %cst_9 = arith.constant dense<0.000000e+00> : vector<24xf32>
    %22 = vector.multi_reduction <add>, %21, %cst_9 [1] : vector<24x128xf32> to vector<24xf32>
    %23 = vector.shape_cast %22 : vector<24xf32> to vector<24x1xf32>
    %24 = arith.mulf %23, %23 : vector<24x1xf32>
    %cst_10 = arith.constant 1.000000e+00 : f32
    %25 = vector.broadcast %cst_10 : f32 to vector<24x1xf32>
    %26 = arith.subf %25, %24 : vector<24x1xf32>
    %cst_11 = arith.constant 0.000000e+00 : f32
    %cst_12 = arith.constant 1.000000e+00 : f32
    %27 = vector.broadcast %cst_11 : f32 to vector<24x1xf32>
    %28 = arith.maximumf %27, %26 : vector<24x1xf32>
    %29 = vector.broadcast %cst_12 : f32 to vector<24x1xf32>
    %30 = arith.minimumf %29, %28 : vector<24x1xf32>
    %31 = math.sqrt %30 : vector<24x1xf32>
    %cst_13 = arith.constant 0.87758255 : f32
    %32 = vector.broadcast %cst_13 : f32 to vector<24x1xf32>
    %33 = arith.mulf %23, %32 : vector<24x1xf32>
    %cst_14 = arith.constant 0.47942555 : f32
    %34 = vector.broadcast %cst_14 : f32 to vector<24x1xf32>
    %35 = arith.mulf %31, %34 : vector<24x1xf32>
    %36 = arith.subf %33, %35 : vector<24x1xf32>
    %cst_15 = arith.constant -0.87758255 : f32
    %37 = vector.broadcast %cst_15 : f32 to vector<24x1xf32>
    %38 = arith.cmpf ogt, %23, %37 : vector<24x1xf32>
    %cst_16 = arith.constant 0.239712775 : f32
    %39 = vector.broadcast %cst_16 : f32 to vector<24x1xf32>
    %40 = arith.subf %23, %39 : vector<24x1xf32>
    %41 = arith.select %38, %36, %40 : vector<24x1xi1>, vector<24x1xf32>
    %42 = vector.shape_cast %41 : vector<24x1xf32> to vector<24x1xf32>
    %43 = vector.broadcast %42 : vector<24x1xf32> to vector<24x128xf32>
    %44 = arith.select %12, %43, %6 : vector<24x128xi1>, vector<24x128xf32>
    %c0_17 = arith.constant 0 : index
    %c0_18 = arith.constant 0 : index
    %45 = vector.load %arg5[%c0_17, %c0_18] : memref<24x128xf32, #tpu.memory_space<vmem>>, vector<24x128xf32>
    tpu.vector_store %arg5[%c0_17, %c0_18], %44 {strides = array<i32>} : memref<24x128xf32, #tpu.memory_space<vmem>>, vector<24x128xf32>,
    %c0_19 = arith.constant 0 : index
    %c0_20 = arith.constant 0 : index
    %46 = vector.load %arg9[%c0_19, %c0_20] : memref<24x1xf32, #tpu.memory_space<vmem>>, vector<24x1xf32>
    %cst_21 = arith.constant 0.000000e+00 : f32
    %47 = vector.broadcast %cst_21 : f32 to vector<24x1xf32>
    %48 = arith.select %19, %41, %47 : vector<24x1xi1>, vector<24x1xf32>
    %49 = arith.addf %46, %48 : vector<24x1xf32>
    %c0_22 = arith.constant 0 : index
    %c0_23 = arith.constant 0 : index
    %50 = vector.load %arg9[%c0_22, %c0_23] : memref<24x1xf32, #tpu.memory_space<vmem>>, vector<24x1xf32>
    tpu.vector_store %arg9[%c0_22, %c0_23], %49 {strides = array<i32>} : memref<24x1xf32, #tpu.memory_space<vmem>>, vector<24x1xf32>,
    %cst_24 = arith.constant dense<0xFF800000> : vector<24xf32>
    %51 = vector.multi_reduction <maximumf>, %44, %cst_24 [1] : vector<24x128xf32> to vector<24xf32>
    %52 = vector.shape_cast %51 : vector<24xf32> to vector<24x1xf32>
    %c0_25 = arith.constant 0 : index
    %c0_26 = arith.constant 0 : index
    %53 = vector.load %arg7[%c0_25, %c0_26] : memref<24x1xf32, #tpu.memory_space<vmem>>, vector<24x1xf32>
    %54 = arith.maximumf %53, %52 : vector<24x1xf32>
    %c0_27 = arith.constant 0 : index
    %c0_28 = arith.constant 0 : index
    %55 = vector.load %arg7[%c0_27, %c0_28] : memref<24x1xf32, #tpu.memory_space<vmem>>, vector<24x1xf32>
    %56 = arith.subf %55, %54 : vector<24x1xf32>
    %cst_29 = arith.constant 2.000000e+01 : f32
    %57 = vector.broadcast %cst_29 : f32 to vector<24x1xf32>
    %58 = arith.mulf %56, %57 : vector<24x1xf32>
    %59 = math.exp %58 : vector<24x1xf32>
    %60 = vector.broadcast %54 : vector<24x1xf32> to vector<24x128xf32>
    %61 = arith.subf %44, %60 : vector<24x128xf32>
    %cst_30 = arith.constant 2.000000e+01 : f32
    %62 = vector.broadcast %cst_30 : f32 to vector<24x128xf32>
    %63 = arith.mulf %61, %62 : vector<24x128xf32>
    %64 = math.exp %63 : vector<24x128xf32>
    %c0_31 = arith.constant 0 : index
    %c0_32 = arith.constant 0 : index
    %65 = vector.load %arg8[%c0_31, %c0_32] : memref<24x1xf32, #tpu.memory_space<vmem>>, vector<24x1xf32>
    %66 = arith.mulf %65, %59 : vector<24x1xf32>
    %cst_33 = arith.constant dense<0.000000e+00> : vector<24xf32>
    %67 = vector.multi_reduction <add>, %64, %cst_33 [1] : vector<24x128xf32> to vector<24xf32>
    %68 = vector.shape_cast %67 : vector<24xf32> to vector<24x1xf32>
    %69 = arith.addf %66, %68 : vector<24x1xf32>
    %c0_34 = arith.constant 0 : index
    %c0_35 = arith.constant 0 : index
    %70 = vector.load %arg8[%c0_34, %c0_35] : memref<24x1xf32, #tpu.memory_space<vmem>>, vector<24x1xf32>
    tpu.vector_store %arg8[%c0_34, %c0_35], %69 {strides = array<i32>} : memref<24x1xf32, #tpu.memory_space<vmem>>, vector<24x1xf32>,
    %c0_36 = arith.constant 0 : index
    %c0_37 = arith.constant 0 : index
    %71 = vector.load %arg7[%c0_36, %c0_37] : memref<24x1xf32, #tpu.memory_space<vmem>>, vector<24x1xf32>
    tpu.vector_store %arg7[%c0_36, %c0_37], %54 {strides = array<i32>} : memref<24x1xf32, #tpu.memory_space<vmem>>, vector<24x1xf32>,
    %c3_i32 = arith.constant 3 : i32
    %72 = arith.cmpi eq, %arg1, %c3_i32 : i32
    %73 = arith.extui %72 : i1 to i32
    %c0_i32_38 = arith.constant 0 : i32
    %74 = arith.cmpi ne, %73, %c0_i32_38 : i32
    scf.if %74 {
      %c0_39 = arith.constant 0 : index
      %c0_40 = arith.constant 0 : index
      %75 = vector.load %arg7[%c0_39, %c0_40] : memref<24x1xf32, #tpu.memory_space<vmem>>, vector<24x1xf32>
      %cst_41 = arith.constant 2.000000e+01 : f32
      %76 = vector.broadcast %cst_41 : f32 to vector<24x1xf32>
      %77 = arith.mulf %75, %76 : vector<24x1xf32>
      %c0_42 = arith.constant 0 : index
      %c0_43 = arith.constant 0 : index
      %78 = vector.load %arg8[%c0_42, %c0_43] : memref<24x1xf32, #tpu.memory_space<vmem>>, vector<24x1xf32>
      %79 = math.log %78 : vector<24x1xf32>
      %80 = arith.addf %77, %79 : vector<24x1xf32>
      %c0_44 = arith.constant 0 : index
      %c0_45 = arith.constant 0 : index
      %81 = vector.load %arg9[%c0_44, %c0_45] : memref<24x1xf32, #tpu.memory_space<vmem>>, vector<24x1xf32>
      %cst_46 = arith.constant 2.000000e+01 : f32
      %82 = vector.broadcast %cst_46 : f32 to vector<24x1xf32>
      %83 = arith.mulf %81, %82 : vector<24x1xf32>
      %84 = arith.subf %80, %83 : vector<24x1xf32>
      %c0_47 = arith.constant 0 : index
      %c0_48 = arith.constant 0 : index
      %85 = vector.load %arg6[%c0_47, %c0_48] : memref<24x1xf32, #tpu.memory_space<vmem>>, vector<24x1xf32>
      tpu.vector_store %arg6[%c0_47, %c0_48], %84 {strides = array<i32>} : memref<24x1xf32, #tpu.memory_space<vmem>>, vector<24x1xf32>,
    } else {
    }
    return
  }
  func.func @transform_0(%arg0: i32, %arg1: i32) -> (i32, i32) {
    %c0_i32 = arith.constant 0 : i32
    %c0_i32_0 = arith.constant 0 : i32
    return %arg0, %c0_i32 : i32, i32
  }
  func.func @transform_1(%arg0: i32, %arg1: i32) -> (i32, i32) {
    %c0_i32 = arith.constant 0 : i32
    %c0_i32_0 = arith.constant 0 : i32
    return %c0_i32, %arg1 : i32, i32
  }
  func.func @transform_2(%arg0: i32, %arg1: i32) -> (i32, i32) {
    %c0_i32 = arith.constant 0 : i32
    %c0_i32_0 = arith.constant 0 : i32
    return %arg0, %c0_i32 : i32, i32
  }
  func.func @transform_3(%arg0: i32, %arg1: i32) -> (i32, i32) {
    %c0_i32 = arith.constant 0 : i32
    return %arg0, %arg1 : i32, i32
  }
  func.func @transform_4(%arg0: i32, %arg1: i32) -> (i32, i32) {
    %c0_i32 = arith.constant 0 : i32
    %c0_i32_0 = arith.constant 0 : i32
    return %arg0, %c0_i32 : i32, i32
  }
}

</mosaic_0001>

<bundles_post_ra>
// kernel: tpu_custom_call.1
= control target key start
LH: loop header
LB: loop body
LE: loop exit
PB: predicated region body
PF: predicated region fallthrough
CT: control target
= control target key end

     0   :  { %10 = vsyncpa [#allocation6], 0  ;;  %s1419_s0 = inlined_call_operand.vmem [shape: f32[48,64], index: 0, kind: input, shape index: {}]   ;;  %s1420_s1 = inlined_call_operand.hbm [shape: f32[64,512], index: 1, kind: input, shape index: {}]   ;;  %s1421_s2 = inlined_call_operand.vmem [shape: s32[48,1], index: 2, kind: input, shape index: {}]   ;;  %s1422_s3 = inlined_call_operand.hbm [shape: f32[48,512], index: 3, kind: output, shape index: {0}]   ;;  %s1423_s4 = inlined_call_operand.vmem [shape: f32[48,1], index: 4, kind: output, shape index: {1}]  }
   0x1   :  { %12 = vsyncpa [#allocation6 + $0x1], 0 }
   0x2   :  { %13 = vsyncpa [#allocation7], 0 }
   0x3   :  { %15 = vsyncpa [#allocation7 + $0x1], 0  ;;  %s1112_s15 = smov 0   ;;  %s1114_s16 = smov 0  }
   0x4   :  { %s1116_s17 = smov 0   ;;  %s1118_s18 = smov 0  }
   0x5   :  { %s1120_s19 = smov 0   ;;  %s1122_s20 = smov 0  }
   0x6   :  { %s1124_s21 = smov 0   ;;  %s1126_s22 = smov 0  }
   0x7   :  { %s1128_s23 = smov 0   ;;  %s1130_s24 = smov 0  }
   0x8   :  { %s1132_s25 = smov 0  }
   0x9 LB: > { %1427 = sst [smem:[#allocation11_spill]] %s1072_s24  ;;  %s744_s26 = sadd.s32 4294967295, %s1076_s25   ;;  %s1076_s25 = sphi %s1132_s25, %s21_s25   ;;  %s1072_s24 = sphi %s1130_s24, %s1446_s24   ;;  %s1068_s23 = sphi %s1128_s23, %s1454_s23   ;;  %s1064_s22 = sphi %s1126_s22, %s1444_s22   ;;  %s1060_s21 = sphi %s1124_s21, %s1453_s21   ;;  %s1056_s20 = sphi %s1122_s20, %s1452_s20   ;;  %s1052_s19 = sphi %s1120_s19, %s1451_s19   ;;  %s1048_s18 = sphi %s1118_s18, %s1450_s18   ;;  %s1044_s17 = sphi %s1116_s17, %s1449_s17   ;;  %s1040_s16 = sphi %s1114_s16, %s1448_s16   ;;  %s1036_s15 = sphi %s1112_s15, %s1447_s15  }
   0xa   : > { %s745_s27 = sadd.s32 4294967294, %s1076_s25   ;;  %s30_s28 = sadd.s32 1, %s1068_s23 }
   0xb   : > { %s33_s29 = sadd.s32 1, %s1072_s24  ;;  %p31_p0 = scmp.ge.s32.totalorder %s30_s28, 4 }
   0xc   : > { %s66_s30 = sadd.s32 1, %s1056_s20  ;;  %p73_p1 = scmp.ne.s32.totalorder %s1056_s20, %s1052_s19 }
   0xd   : > { %p74_p2 = scmp.eq.s32.totalorder %s1076_s25, 0  ;;  %s1456_s28 = smov (%p31_p0, %s30_s28), 0 }
   0xe   : > { %1428 = sst [smem:[#allocation12_spill]] %s1456_s28  ;;  %s1458_s29 = smov (!%p31_p0, %s33_s29), %s1072_s24 }
   0xf   : > { %s63_s5 = ssub.s32 %s1068_s23, %s1456_s28  ;;  %p1178_p3 = por %p74_p2, %p73_p1 }
  0x10   : > { %p35_p4 = scmp.ge.s32.totalorder %s1458_s29, 2  ;;  %p64_p5 = scmp.eq.s32.totalorder %s63_s5, 0 }
  0x11   : > { %p79_p6 = scmp.ne.s32.totalorder %s1052_s19, %s1048_s18  ;;  %p80_p7 = scmp.eq.s32.totalorder %s744_s26, 0 }
  0x12   : > { %s1460_s29 = smov (%p35_p4, %s1458_s29), 0  ;;  %s120_s11 = sadd.s32 1, %s1044_s17 }
  0x13   : > { %1430 = sst [smem:[#allocation13_spill]] %s1460_s29  ;;  %p1188_p8 = por %p80_p7, %p79_p6 }
  0x14   : > { %s1186_s7 = scalar_select %p64_p5, %s1056_s20, %s66_s30  }
  0x15   : > { %s115_s9 = ssub.s32 %s1072_s24, %s1460_s29  ;;  %p130_p10 = scmp.ne.s32.totalorder %s1044_s17, %s1040_s16 }
  0x16   : > { %1431 = sst [smem:[#allocation14_spill]] %s1186_s7  ;;  %s117_s10 = sor.u32 %s115_s9, %s63_s5 }
  0x17   : > { %p118_p9 = scmp.eq.s32.totalorder %s117_s10, 0  ;;  %p131_p11 = scmp.eq.s32.totalorder %s744_s26, 7 }
  0x18   : > { %p136_p12 = scmp.ne.s32.totalorder %s1040_s16, %s1036_s15  ;;  %p137_p0 = scmp.eq.s32.totalorder %s745_s27, 7 }
  0x19   : > { %s1200_s12 = scalar_select %p118_p9, %s1044_s17, %s120_s11  }
  0x1a   : > { %p1202_p13 = por %p131_p11, %p130_p10  ;;  %p798_p1 = scmp.lt.s32.totalorder %s1076_s25, 8 }
  0x1b   : > { %1433 = sst [smem:[#allocation15_spill]] %s1200_s12  ;;  %p1207_p2 = por %p137_p0, %p136_p12 }
  0x1c   : > { %s192_s18 = sand.u32 1, %s1056_s20   ;;  %s749_s5 = sshll.u32 %s1068_s23, 3 }
  0x1d   : > { %s748_s30 = sshll.u32 %s192_s18, 6  ;;  %s200_s10 = scalar_lea.hbm %s1420_s1, %s749_s5 }
  0x1e   : > { %s196_s11 = scalar_lea.vmem [#allocation5], %s748_s30  ;;  %s201_s28 = sshll.u32 %s200_s10, 4  ;;  %s202_s28 = int_to_ptr.hbm [resolvable:$true] %s201_s28 }
  0x1f   : > { %s203_s29 = sshll.u32 %s196_s11, 4  ;;  %p791_p4 = pnand %p798_p1, %p1178_p3  ;;  %s204_s29 = int_to_ptr.vmem [resolvable:$true] %s203_s29 }
  0x20   : > { %s193_s27 = scalar_lea.sflag [#allocation6], %s192_s18  ;;  %s1078_s24 = smov 512  }
  0x21   : > { %s1079_s7 = smov 128   ;;  %s1080_s12 = smov 8  }
  0x22   : > { %793 = dma.hbm_to_vmem [thread:$0]  (!%p791_p4), %s202_s28, 1024, %s204_s29, %s193_s27, %s1078_s24, %s1079_s7, %s1080_s12  }
  0x23   : > { %p750_p5 = scmp.ge.s32.totalorder %s1076_s25, 1  ;;  %p220_p6 = scmp.lt.s32.totalorder %s1076_s25, 9 }
  0x25   : > { %p221_p7 = pnand %p750_p5, %p220_p6 }
  0x26   : > { %s226_s26 = sand.u32 (!%p221_p7), 1, %s1052_s19  }
  0x27   : > { %224 = sbr.rel (%p221_p7) target bundleno = 764 (0x2fc), region = 32  ;;  %s751_s5 = sshll.u32 (!%p221_p7), %s226_s26, 6 }
  0x28   : > { %s227_s30 = scalar_lea.sflag (!%p221_p7), [#allocation6], %s226_s26  ;;  %s1221_s9 = scalar_lea.vmem (!%p221_p7), [#allocation5], %s751_s5 }
  0x2c   : > { %1027 = dma.done.wait (%p1188_p8), %s227_s30, 1024  }
  0x2d   : > { %1029 = vsyncadd (%p1188_p8), %s227_s30, 4294966272  ;;  %s261_s24 = sand.u32 1, %s1040_s16   ;;  %s271_s28 = smul.u32 3, %s1064_s22 }
  0x2e   : > { %s785_s29 = smul.u32 24, %s261_s24  ;;  %p755_p8 = scmp.ne.s32.totalorder %s1060_s21, 0 }
  0x2f   : > { %p272_p3 = scmp.lt.s32.totalorder %s271_s28, 5 }
  0x30   : > { %s1246_s30 = scalar_lea.vmem [#allocation8], %s785_s29  ;;  %293 = sbr.rel (%p755_p8) target bundleno = 63 (0x3f), region = 40 }
  0x31   : > { %s1462_s28 = smov (!%p272_p3, %s271_s28), 5 }
  0x32   : > { %s752_s6 = sshll.u32 %s1462_s28, 3 }
  0x33   : > { %s1234_s18 = scalar_lea.vmem %s1419_s0, %s752_s6  ;;  %s1239_s8 = scalar_lea.vmem %s1421_s2, %s752_s6 }
  0x34   : > { %s1244_s5 = scalar_lea.vmem %s1423_s4, %s752_s6 }
  0x35   : > { %vm294_vm0 = vcmask 7168   ;;  %v1081_v0 = vmov -inf   ;;  %v1082_v1 = vmov 0.0  }
  0x36   : > { %295 = vst.msk [vmem:[#allocation2] sm:$0xff] %vm294_vm0, %v1081_v0 }
  0x37   : > { %296 = vst.msk [vmem:[#allocation2 + $0x8] sm:$0xff] %vm294_vm0, %v1081_v0 }
  0x38   : > { %297 = vst.msk [vmem:[#allocation2 + $0x10] sm:$0xff] %vm294_vm0, %v1081_v0 }
  0x39   : > { %298 = vst.msk [vmem:[#allocation3] sm:$0xff] %vm294_vm0, %v1082_v1 }
  0x3a   : > { %299 = vst.msk [vmem:[#allocation3 + $0x8] sm:$0xff] %vm294_vm0, %v1082_v1 }
  0x3b   : > { %300 = vst.msk [vmem:[#allocation3 + $0x10] sm:$0xff] %vm294_vm0, %v1082_v1 }
  0x3c   : > { %301 = vst.msk [vmem:[#allocation4] sm:$0xff] %vm294_vm0, %v1082_v1 }
  0x3d   : > { %302 = vst.msk [vmem:[#allocation4 + $0x8] sm:$0xff] %vm294_vm0, %v1082_v1 }
  0x3e   : > { %303 = vst.msk [vmem:[#allocation4 + $0x10] sm:$0xff] %vm294_vm0, %v1082_v1 }
  0x3f PF: > { %v314_v2 = vld [vmem:[%s1221_s9 + $0x38] sm:$0xff]  ;;  %v313_v3 = vld [vmem:[%s1221_s9 + $0x30] sm:$0xff]  ;;  %s759_s28 = sshll.u32 %s1060_s21, 7  ;;  %v312_v6 = vld [vmem:[%s1221_s9 + $0x28] sm:$0xff]  ;;  %v1083_v7 = vmov 0   ;;  %vm318_vm10 = vcmask 523264   ;;  %v354_v23 = vlaneseq }
  0x40   : > { %336 = vmatpush.msra.mxu0 %v314_v2  ;;  %769 = vmatpush.msra.mxu1 %v314_v2  ;;  %v315_v4 = vld [vmem:[%s1239_s8] sm:$0xff]  ;;  %v357_v5 = vstv %s759_s28  ;;  %s374_s29 = sadd.s32 128, %s759_s28  ;;  %v316_v9 = vld [vmem:[%s1239_s8 + $0x8] sm:$0xff]  ;;  %v317_v12 = vld [vmem:[%s1239_s8 + $0x10] sm:$0xff]  ;;  %p763_p9 = scmp.ne.s32.totalorder %s1060_s21, 3 }
  0x41   : > { %770 = vmatpush.msra.mxu2 %v314_v2  ;;  %897 = vset.pattern.permute.xlu0 %v1083_v7  ;;  %v375_v8 = vstv %s374_s29  ;;  %vm371_vm1 = vcmp.ge.s32.totalorder %v315_v4, %v357_v5  ;;  %v311_v10 = vld [vmem:[%s1221_s9 + $0x20] sm:$0xff]  ;;  %vm372_vm4 = vcmp.ge.s32.totalorder %v316_v9, %v357_v5  ;;  %vm373_vm7 = vcmp.ge.s32.totalorder %v317_v12, %v357_v5  ;;  %v310_v14 = vld [vmem:[%s1221_s9 + $0x18] sm:$0xff]  ;;  %v309_v16 = vld [vmem:[%s1221_s9 + $0x10] sm:$0xff] }
  0x42   : > { %337 = vmatpush.msra.mxu0 %v313_v3  ;;  %771 = vmatpush.msra.mxu1 %v313_v3  ;;  %vm376_vm2 = vcmp.lt.s32.totalorder %v315_v4, %v375_v8  ;;  %vm377_vm5 = vcmp.lt.s32.totalorder %v316_v9, %v375_v8  ;;  %vm378_vm8 = vcmp.lt.s32.totalorder %v317_v12, %v375_v8  ;;  %v308_v17 = vld [vmem:[%s1221_s9 + $0x8] sm:$0xff]  ;;  %v307_v18 = vld [vmem:[%s1221_s9] sm:$0xff]  ;;  %v304_v19 = vld [vmem:[%s1234_s18] sm:$0xff]  ;;  %v355_v24 = vand.u32 127, %v354_v23 }
  0x43   : > { %772 = vmatpush.msra.mxu2 %v313_v3  ;;  %360 = vperm.xlu0 %897, %v315_v4   ;;  %vm1256_vm3 = vmand %vm371_vm1, %vm376_vm2  ;;  %v305_v20 = vld [vmem:[%s1234_s18 + $0x8] sm:$0xff]  ;;  %v306_v21 = vld [vmem:[%s1234_s18 + $0x10] sm:$0xff] }
  0x44   : > { %338 = vmatpush.msra.mxu0 %v312_v6  ;;  %773 = vmatpush.msra.mxu1 %v312_v6  ;;  %vm1261_vm6 = vmand %vm372_vm4, %vm377_vm5  ;;  %v1278_v25 = vadd.s32 %v357_v5, %v355_v24  ;;  %vm472_vm5 = vcmask 7168   ;;  %v484_v15 = vld [vmem:[#allocation2 + $0x10] sm:$0xff] }
  0x45   : > { %774 = vmatpush.msra.mxu2 %v312_v6  ;;  %898 = vset.pattern.permute.xlu1 %v1083_v7  ;;  %vm1266_vm9 = vmand %vm373_vm7, %vm378_vm8 }
  0x46   : > { %339 = vmatpush.msra.mxu0 %v311_v10  ;;  %775 = vmatpush.msra.mxu1 %v311_v10 }
  0x47   : > { %776 = vmatpush.msra.mxu2 %v311_v10  ;;  %366 = vperm.xlu1 %898, %v317_v12  }
  0x48   : > { %340 = vmatpush.msra.mxu0 %v310_v14  ;;  %777 = vmatpush.msra.mxu1 %v310_v14 }
  0x49   : > { %778 = vmatpush.msra.mxu2 %v310_v14  ;;  %899 = vset.pattern.permute.xlu2 %v1083_v7 }
  0x4a   : > { %341 = vmatpush.msra.mxu0 %v309_v16  ;;  %779 = vmatpush.msra.mxu1 %v309_v16 }
  0x4b   : > { %780 = vmatpush.msra.mxu2 %v309_v16  ;;  %363 = vperm.xlu0 %897, %v316_v9  }
  0x4c   : > { %342 = vmatpush.msra.mxu0 %v308_v17  ;;  %781 = vmatpush.msra.mxu1 %v308_v17 }
  0x4d   : > { %782 = vmatpush.msra.mxu2 %v308_v17 }
  0x4e   : > { %343 = vmatpush.msra.mxu0 %v307_v18  ;;  %783 = vmatpush.msra.mxu1 %v307_v18 }
  0x4f   : > { %756 = vmatmul.msk.f32.vlgmr.msra.gmra.mxu0 %vm318_vm10, %v304_v19  ;;  %757 = vmatmul.msk.f32.vlgmr.msra.gmra.mxu1 %vm318_vm10, %v305_v20 }
  0x50   : > { %784 = vmatpush.msra.mxu2 %v307_v18 }
  0x51   : > { %758 = vmatmul.msk.f32.vlgmr.msra.gmra.mxu2 %vm318_vm10, %v306_v21  ;;  %v464_v21 = vld [vmem:[#allocation4 + $0x8] sm:$0xff] }
  0xb5   : > { %v1276_v22 = vpop.permute.xlu0 %360 }
  0xb6   : > { %vm368_vm11 = vcmp.eq.s32.totalorder %v1278_v25, %v1276_v22 }
  0xb9   : > { %v1298_v31 = vpop.permute.xlu1 %366 }
  0xba   : > { %vm370_vm13 = vcmp.eq.s32.totalorder %v1278_v25, %v1298_v31 }
  0xbd   : > { %v1280_v26 = vpop.permute.xlu0 %363 }
  0xbe   : > { %vm369_vm12 = vcmp.eq.s32.totalorder %v1278_v25, %v1280_v26 }
  0xcc   : > { %v1286_v27 = vpop.f32.mrf.mxu0  ;;  %v1288_v28 = vpop.f32.mrf.mxu1 }
  0xcd   : > { %v383_v29 = vsel %vm369_vm12, %v1288_v28, 0.0  ;;  %v382_v30 = vsel %vm368_vm11, %v1286_v27, 0.0 }
  0xce   : > { %387 = vadd.xlane.f32.xlu2 %v383_v29  ;;  %385 = vadd.xlane.f32.xlu1 %v382_v30  ;;  %v463_v29 = vld [vmem:[#allocation4] sm:$0xff] }
  0xd4   : > { %v1302_v32 = vpop.f32.mrf.mxu2 }
  0xd5   : > { %v384_v33 = vsel %vm370_vm13, %v1302_v32, 0.0 }
  0xd6   : > { %389 = vadd.xlane.f32.xlu2 %v384_v33 }
 0x141   : > { %v388_v34 = vpop.xlane.xlu2 %387  ;;  %v1308_v35 = vpop.xlane.xlu1 %385 }
 0x142   : > { %v392_v36 = vmul.f32 %v388_v34, %v388_v34  ;;  %v391_v37 = vmul.f32 %v1308_v35, %v1308_v35  ;;  %v440_v7 = vmul.f32 0.87758255, %v388_v34  ;;  %v439_v12 = vmul.f32 0.87758255, %v1308_v35 }
 0x143   : > { %v761_v17 = vadd.f32 -0.23971277, %v388_v34  ;;  %vm449_vm2 = vcmp.gt.f32.partialorder %v388_v34, -0.87758255  ;;  %v760_v20 = vadd.f32 -0.23971277, %v1308_v35 }
 0x144   : > { %v395_v38 = vsub.f32 1.0, %v392_v36  ;;  %v394_v39 = vsub.f32 1.0, %v391_v37  ;;  %vm448_vm4 = vcmp.gt.f32.partialorder %v1308_v35, -0.87758255 }
 0x146   : > { %v398_v40 = vmax.f32 %v395_v38, 0.0  ;;  %v397_v41 = vmax.f32 %v394_v39, 0.0 }
 0x148   : > { %v401_v42 = vmin.f32 %v398_v40, 1.0  ;;  %v400_v43 = vmin.f32 %v397_v41, 1.0  ;;  %v465_v41 = vld [vmem:[#allocation4 + $0x10] sm:$0xff] }
 0x149   : > { %v1312_v44 = vpop.xlane.xlu2 %389 }
 0x14a   : > { %900 = vrsqrt.f32 %v401_v42  ;;  %v393_v45 = vmul.f32 %v1312_v44, %v1312_v44  ;;  %vm422_vm14 = vcmp.eq.f32.partialorder %v401_v42, inf  ;;  %vm424_vm15 = vcmp.eq.f32.partialorder %v401_v42, 0.0 }
 0x14b   : > { %902 = vrsqrt.f32 %v400_v43  ;;  %v425_v0 = vand.u32 2147483648, %v401_v42  ;;  %vm410_vm0 = vcmp.eq.f32.partialorder %v400_v43, inf  ;;  %v413_v3 = vand.u32 2147483648, %v400_v43 }
 0x14c   : > { %v396_v46 = vsub.f32 1.0, %v393_v45  ;;  %vm412_vm1 = vcmp.eq.f32.partialorder %v400_v43, 0.0  ;;  %v441_v40 = vmul.f32 0.87758255, %v1312_v44  ;;  %v762_v11 = vadd.f32 -0.23971277, %v1312_v44 }
 0x14e   : > { %v399_v48 = vmax.f32 %v396_v46, 0.0 }
 0x150   : > { %v901_v47 = vpop.eup %900  ;;  %v402_v52 = vmin.f32 %v399_v48, 1.0  ;;  %v482_v48 = vld [vmem:[#allocation2] sm:$0xff] }
 0x151   : > { %v903_v49 = vpop.eup %902  ;;  %v416_v50 = vmul.f32 %v901_v47, %v401_v42 }
 0x152   : > { %v404_v51 = vmul.f32 %v903_v49, %v400_v43  ;;  %904 = vrsqrt.f32 %v402_v52  ;;  %vm434_vm7 = vcmp.eq.f32.partialorder %v402_v52, inf }
 0x153   : > { %v417_v53 = vmul.f32 %v901_v47, %v416_v50 }
 0x154   : > { %v405_v54 = vmul.f32 %v903_v49, %v404_v51 }
 0x155   : > { %v418_v55 = vmul.f32 0.5, %v417_v53 }
 0x156   : > { %v406_v56 = vmul.f32 0.5, %v405_v54 }
 0x157   : > { %v419_v57 = vsub.f32 1.5, %v418_v55 }
 0x158   : > { %v407_v58 = vsub.f32 1.5, %v406_v56  ;;  %v905_v60 = vpop.eup %904 }
 0x159   : > { %v420_v59 = vmul.f32 %v901_v47, %v419_v57  ;;  %v428_v63 = vmul.f32 %v905_v60, %v402_v52  ;;  %v483_v47 = vld [vmem:[#allocation2 + $0x8] sm:$0xff] }
 0x15a   : > { %v408_v61 = vmul.f32 %v903_v49, %v407_v58 }
 0x15b   : > { %v421_v62 = vmul.f32 %v420_v59, %v401_v42  ;;  %v429_v4 = vmul.f32 %v905_v60, %v428_v63 }
 0x15c   : > { %v409_v1 = vmul.f32 %v408_v61, %v400_v43 }
 0x15d   : > { %v423_v2 = vsel %vm422_vm14, %v401_v42, %v421_v62  ;;  %v430_v10 = vmul.f32 0.5, %v429_v4 }
 0x15e   : > { %v426_v5 = vsel %vm424_vm15, %v425_v0, %v423_v2  ;;  %v411_v6 = vsel %vm410_vm0, %v400_v43, %v409_v1 }
 0x15f   : > { %v443_v8 = vmul.f32 0.47942555, %v426_v5  ;;  %v414_v9 = vsel %vm412_vm1, %v413_v3, %v411_v6  ;;  %v431_v18 = vsub.f32 1.5, %v430_v10  ;;  %v527_v10 = vld [vmem:[#allocation3] sm:$0xff] }
 0x160   : > { %v442_v14 = vmul.f32 0.47942555, %v414_v9 }
 0x161   : > { %v446_v16 = vsub.f32 %v440_v7, %v443_v8  ;;  %v432_v23 = vmul.f32 %v905_v60, %v431_v18 }
 0x162   : > { %v445_v19 = vsub.f32 %v439_v12, %v442_v14 }
 0x163   : > { %v455_v24 = vsel %vm449_vm2, %v446_v16, %v761_v17  ;;  %v433_v36 = vmul.f32 %v432_v23, %v402_v52 }
 0x164   : > { %v1323_v30 = vsel %vm369_vm12, %v455_v24, %v1288_v28  ;;  %v467_v33 = vsel %vm1261_vm6, %v455_v24, 0.0  ;;  %v454_v34 = vsel %vm448_vm4, %v445_v19, %v760_v20  ;;  %v437_v28 = vand.u32 2147483648, %v402_v52  ;;  %v529_v19 = vld [vmem:[#allocation3 + $0x10] sm:$0xff] }
 0x165   : > { %v470_v37 = vadd.f32 %v467_v33, %v464_v21  ;;  %478 = vmax.xlane.f32.xlu2 %v1323_v30  ;;  %461 = vst [vmem:[%s1246_s30 + $0x8] sm:$0xff] %v1323_v30  ;;  %v457_v35 = vsel %vm368_vm11, %v454_v34, %v1286_v27  ;;  %v466_v26 = vsel %vm1256_vm3, %v454_v34, 0.0  ;;  %v435_v38 = vsel %vm434_vm7, %v402_v52, %v433_v36 }
 0x166   : > { %v469_v13 = vadd.f32 %v466_v26, %v463_v29  ;;  %476 = vmax.xlane.f32.xlu0 %v457_v35  ;;  %460 = vst [vmem:[%s1246_s30] sm:$0xff] %v457_v35  ;;  %vm436_vm6 = vcmp.eq.f32.partialorder %v402_v52, 0.0  ;;  %vm450_vm3 = vcmp.gt.f32.partialorder %v1312_v44, -0.87758255 }
 0x167   : > { %474 = vst.msk [vmem:[#allocation4 + $0x8] sm:$0xff] %vm472_vm5, %v470_v37  ;;  %v438_v39 = vsel %vm436_vm6, %v437_v28, %v435_v38 }
 0x168   : > { %473 = vst.msk [vmem:[#allocation4] sm:$0xff] %vm472_vm5, %v469_v13  ;;  %v444_v22 = vmul.f32 0.47942555, %v438_v39 }
 0x16a   : > { %v447_v27 = vsub.f32 %v441_v40, %v444_v22 }
 0x16c   : > { %v456_v42 = vsel %vm450_vm3, %v447_v27, %v762_v11 }
 0x16d   : > { %v459_v43 = vsel %vm370_vm13, %v456_v42, %v1302_v32  ;;  %v468_v45 = vsel %vm1266_vm9, %v456_v42, 0.0 }
 0x16e   : > { %v471_v46 = vadd.f32 %v468_v45, %v465_v41  ;;  %480 = vmax.xlane.f32.xlu2 %v459_v43  ;;  %462 = vst [vmem:[%s1246_s30 + $0x10] sm:$0xff] %v459_v43 }
 0x170   : > { %475 = vst.msk [vmem:[#allocation4 + $0x10] sm:$0xff] %vm472_vm5, %v471_v46 }
 0x1d8   : > { %v479_v49 = vpop.xlane.xlu2 %478 }
 0x1d9   : > { %v486_v50 = vmax.f32 %v483_v47, %v479_v49  ;;  %v477_v44 = vpop.xlane.xlu0 %476 }
 0x1da   : > { %v485_v51 = vmax.f32 %v482_v48, %v477_v44 }
 0x1db   : > { %v489_v52 = vsub.f32 %v483_v47, %v486_v50  ;;  %546 = vst.msk [vmem:[#allocation2 + $0x8] sm:$0xff] %vm472_vm5, %v486_v50  ;;  %507 = vperm.xlu1 %898, %v486_v50  }
 0x1dc   : > { %v488_v25 = vsub.f32 %v482_v48, %v485_v51  ;;  %545 = vst.msk [vmem:[#allocation2] sm:$0xff] %vm472_vm5, %v485_v51  ;;  %502 = vperm.xlu2 %899, %v485_v51  }
 0x1dd   : > { %v492_v18 = vmul.f32 20.0, %v489_v52 }
 0x1de   : > { %v491_v5 = vmul.f32 20.0, %v488_v25 }
 0x1df   : > { %v496_v21 = vmul.f32 1.442695, %v492_v18 }
 0x1e0   : > { %v494_v6 = vmul.f32 1.442695, %v491_v5 }
 0x1e1   : > { %v481_v31 = vpop.xlane.xlu2 %480 }
 0x1e2   : > { %v487_v32 = vmax.f32 %v484_v15, %v481_v31 }
 0x1e4   : > { %v490_v53 = vsub.f32 %v484_v15, %v487_v32  ;;  %547 = vst.msk [vmem:[#allocation2 + $0x10] sm:$0xff] %vm472_vm5, %v487_v32  ;;  %512 = vperm.xlu2 %899, %v487_v32  }
 0x1e6   : > { %v493_v7 = vmul.f32 20.0, %v490_v53 }
 0x1e8   : > { %v498_v8 = vmul.f32 1.442695, %v493_v7 }
 0x236   : > { %v503_v54 = vpop.permute.xlu2 %502 }
 0x237   : > { %v515_v55 = vsub.f32 %v457_v35, %v503_v54 }
 0x239   : > { %v518_v56 = vmul.f32 20.0, %v515_v55 }
 0x23b   : > { %v521_v57 = vmul.f32 1.442695, %v518_v56 }
 0x23d   : > { %906 = vpow2.f32 %v521_v57 }
 0x23e   : > { %v513_v58 = vpop.permute.xlu2 %512 }
 0x23f   : > { %v517_v59 = vsub.f32 %v459_v43, %v513_v58 }
 0x241   : > { %v520_v60 = vmul.f32 20.0, %v517_v59 }
 0x243   : > { %v907_v61 = vpop.eup %906  ;;  %v525_v62 = vmul.f32 1.442695, %v520_v60 }
 0x244   : > { %533 = vadd.xlane.f32.xlu0 %v907_v61 }
 0x245   : > { %908 = vpow2.f32 %v525_v62 }
 0x24b   : > { %v909_v63 = vpop.eup %908 }
 0x24c   : > { %537 = vadd.xlane.f32.xlu0 %v909_v63 }
 0x24d   : > { %v508_v0 = vpop.permute.xlu1 %507 }
 0x24e   : > { %v516_v1 = vsub.f32 %v1323_v30, %v508_v0  ;;  %v528_v30 = vld [vmem:[#allocation3 + $0x8] sm:$0xff] }
 0x250   : > { %v519_v2 = vmul.f32 20.0, %v516_v1 }
 0x252   : > { %v523_v3 = vmul.f32 1.442695, %v519_v2 }
 0x254   : > { %910 = vpow2.f32 %v523_v3 }
 0x255   : > { %912 = vpow2.f32 %v494_v6 }
 0x256   : > { %914 = vpow2.f32 %v498_v8 }
 0x257   : > { %916 = vpow2.f32 %v496_v21 }
 0x25a   : > { %v911_v4 = vpop.eup %910 }
 0x25b   : > { %535 = vadd.xlane.f32.xlu2 %v911_v4  ;;  %v913_v9 = vpop.eup %912 }
 0x25c   : > { %v530_v12 = vmul.f32 %v913_v9, %v527_v10  ;;  %v915_v17 = vpop.eup %914 }
 0x25d   : > { %v532_v20 = vmul.f32 %v915_v17, %v529_v19  ;;  %v917_v29 = vpop.eup %916 }
 0x25e   : > { %v531_v33 = vmul.f32 %v917_v29, %v528_v30 }
 0x2b7   : > { %v534_v14 = vpop.xlane.xlu0 %533 }
 0x2b8   : > { %v539_v16 = vadd.f32 %v534_v14, %v530_v12 }
 0x2ba   : > { %542 = vst.msk [vmem:[#allocation3] sm:$0xff] %vm472_vm5, %v539_v16 }
 0x2bf   : > { %v538_v23 = vpop.xlane.xlu0 %537 }
 0x2c0   : > { %v541_v24 = vadd.f32 %v538_v23, %v532_v20 }
 0x2c2   : > { %544 = vst.msk [vmem:[#allocation3 + $0x10] sm:$0xff] %vm472_vm5, %v541_v24 }
 0x2cd   : > { %551 = sbr.rel (%p763_p9) target bundleno = 744 (0x2e8), region = 44 }
 0x2ce   : > { %v536_v34 = vpop.xlane.xlu2 %535 }
 0x2cf   : > { %v540_v36 = vadd.f32 %v536_v34, %v531_v33 }
 0x2d1   : > { %543 = vst.msk [vmem:[#allocation3 + $0x8] sm:$0xff] %vm472_vm5, %v540_v36 }
 0x2d2   : > { %v558_v37 = vld [vmem:[#allocation3] sm:$0xff]  ;;  %v560_v26 = vld [vmem:[#allocation3 + $0x10] sm:$0xff]  ;;  %v552_v28 = vld [vmem:[#allocation2] sm:$0xff] }
 0x2d3   : > { %918 = vlog2.f32 %v558_v37  ;;  %v553_v13 = vld [vmem:[#allocation2 + $0x8] sm:$0xff]  ;;  %v570_v38 = vld [vmem:[#allocation4] sm:$0xff]  ;;  %v555_v40 = vmul.f32 20.0, %v552_v28  ;;  %v571_v22 = vld [vmem:[#allocation4 + $0x8] sm:$0xff] }
 0x2d4   : > { %v554_v39 = vld [vmem:[#allocation2 + $0x10] sm:$0xff]  ;;  %v556_v11 = vmul.f32 20.0, %v553_v13  ;;  %v572_v41 = vld [vmem:[#allocation4 + $0x10] sm:$0xff]  ;;  %v573_v45 = vmul.f32 20.0, %v570_v38  ;;  %v574_v49 = vmul.f32 20.0, %v571_v22 }
 0x2d5   : > { %v557_v46 = vmul.f32 20.0, %v554_v39  ;;  %v575_v51 = vmul.f32 20.0, %v572_v41 }
 0x2d8   : > { %v559_v35 = vld [vmem:[#allocation3 + $0x8] sm:$0xff] }
 0x2d9   : > { %920 = vlog2.f32 %v559_v35  ;;  %v919_v27 = vpop.eup %918 }
 0x2da   : > { %922 = vlog2.f32 %v560_v26  ;;  %v562_v43 = vmul.f32 0.6931472, %v919_v27 }
 0x2dc   : > { %v567_v50 = vadd.f32 %v562_v43, %v555_v40 }
 0x2de   : > { %v576_v25 = vsub.f32 %v567_v50, %v573_v45 }
 0x2df   : > { %v921_v42 = vpop.eup %920 }
 0x2e0   : > { %v923_v47 = vpop.eup %922  ;;  %v564_v48 = vmul.f32 0.6931472, %v921_v42  ;;  %579 = vst.msk [vmem:[%s1244_s5] sm:$0xff] %vm472_vm5, %v576_v25 }
 0x2e1   : > { %v566_v44 = vmul.f32 0.6931472, %v923_v47 }
 0x2e2   : > { %v568_v52 = vadd.f32 %v564_v48, %v556_v11 }
 0x2e3   : > { %v569_v15 = vadd.f32 %v566_v44, %v557_v46 }
 0x2e4   : > { %v577_v31 = vsub.f32 %v568_v52, %v574_v49 }
 0x2e5   : > { %v578_v32 = vsub.f32 %v569_v15, %v575_v51 }
 0x2e6   : > { %580 = vst.msk [vmem:[%s1244_s5 + $0x8] sm:$0xff] %vm472_vm5, %v577_v31 }
 0x2e7   : > { %581 = vst.msk [vmem:[%s1244_s5 + $0x10] sm:$0xff] %vm472_vm5, %v578_v32 }
 0x2e8 PF: > { %s768_s9 = smul.u32 12, %s1064_s22  ;;  %s602_s6 = sshll.u32 %s1246_s30, 4  ;;  %s603_s6 = int_to_ptr.vmem [resolvable:$true] %s602_s6 }
 0x2e9   : > { %s583_s27 = scalar_lea.sflag [#allocation7], %s261_s24 }
 0x2ea   : > { %s599_s7 = sadd.s32 %s1060_s21, %s768_s9  ;;  %s974_s21 = scalar_lea.hbm %s1422_s3, 192 }
 0x2eb   : > { %s765_s12 = sshll.u32 %s599_s7, 3 }
 0x2ec   : > { %s601_s11 = scalar_lea.hbm %s1422_s3, %s765_s12 }
 0x2ed   : > { %s604_s8 = sshll.u32 %s601_s11, 4  ;;  %s605_s8 = int_to_ptr.hbm [resolvable:$true] %s604_s8 }
 0x2ee   : > { %s968_s26 = sshra.s32 %s605_s8, 4  ;;  %s969_s26 = int_to_ptr.hbm [resolvable:$true] %s968_s26 }
 0x2ef   : > { %s970_s5 = scalar_lea.hbm %s969_s26, 24  ;;  %p975_p0 = scmp.lt.s32.totalorder %s969_s26, %s1422_s3 }
 0x2f0   : > { %p971_p10 = scmp.ne.s32.totalorder %s969_s26, %s970_s5  ;;  %p976_p1 = scmp.lt.s32.totalorder %s974_s21, %s970_s5 }
 0x2f2   : > { %p972_p11 = pnand %p971_p10, %p1202_p13  ;;  %p977_p4 = por %p976_p1, %p975_p0 }
 0x2f4   : > { %p973_p12 = pneg %p972_p11 }
 0x2f6   : > { %p978_p5 = pnand %p977_p4, %p973_p12 }
 0x2f8   : > { %981 = shalt.err (!%p978_p5)
}
 0x2f9   : > { %s1084_s24 = smov 128   ;;  %s1085_s9 = smov 512  }
 0x2fa   : > { %s1086_s7 = smov 8  }
 0x2fb   : > { %788 = dma.vmem_to_hbm [thread:$0]  (%p1202_p13), %s603_s6, 384, %s605_s8, %s583_s27, %s1084_s24, %s1085_s9, %s1086_s7  }
 0x2fc PF: > { %p799_p6 = scmp.ge.s32.totalorder %s1076_s25, 2  ;;  %s623_s12 = sand.u32 1, %s1036_s15  }
 0x2fd   : > { %s624_s18 = scalar_lea.sflag [#allocation7], %s623_s12 }
 0x2fe   : > { %p795_p7 = pnand %p799_p6, %p1207_p2 }
 0x300   : > { %p796_p3 = pneg %p795_p7 }
 0x302   : > { %1031 = dma.done.wait (%p796_p3), %s624_s18, 384  }
 0x303   : > { %1033 = vsyncadd (%p796_p3), %s624_s18, 4294966912  ;;  %s21_s25 = sadd.s32 1, %s1076_s25   ;;  %s1442_s10 = sld [smem:[#allocation15_spill]] }
 0x304   : > { %p18_p8 = scmp.ge.s32.totalorder %s21_s25, 10   ;;  %s1443_s13 = sld [smem:[#allocation14_spill]] }
 0x305   : > { %s1444_s22 = sld [smem:[#allocation11_spill]]  ;;  %s1447_s15 = smov %s1040_s16 }
 0x306   : > { %s1445_s6 = sld [smem:[#allocation12_spill]]  ;;  %s1448_s16 = smov %s1044_s17 }
 0x307   : > { %s1446_s24 = sld [smem:[#allocation13_spill]]  ;;  %s1450_s18 = smov %s1052_s19 }
 0x308   : > { %s1451_s19 = smov %s1056_s20  ;;  %s1453_s21 = smov %s1068_s23 }
 0x309   : > { %s1449_s17 = smov %s1442_s10  ;;  %20 = sbr.rel (!%p18_p8) target bundleno = 9 (0x9), region = 103 }
 0x30a   : > { %s1452_s20 = smov %s1443_s13 }
 0x30c   : > { %s1454_s23 = smov %s1445_s6 }
 0x30e   :  { %638 = vsyncpa [#allocation6], 1 }
 0x30f   :  { %640 = vsyncpa [#allocation6 + $0x1], 1 }
 0x310   :  { %641 = vsyncpa [#allocation7], 1 }
 0x311   :  { %643 = vsyncpa [#allocation7 + $0x1], 1 }

</bundles_post_ra>
